<compile_context>
chip_gen: v7x
topology: tpu7x:2x2x1
jax: 0.10.0
libtpu: 0.0.40
codegen_flags: <defaults>
</compile_context>

<pallas_src>
import jax
import jax.numpy as jnp
import numpy as np
from jax.experimental import pallas as pl
from jax.experimental.pallas import tpu as pltpu

# ImageNet normalization constants (the registered buffers of the module).
_IMAGENET_MEAN = np.array([0.485, 0.456, 0.406], dtype=np.float32)
_IMAGENET_STD = np.array([0.229, 0.224, 0.225], dtype=np.float32)

# Folded affine: (x - mean) / std == x * scale + bias  (precomputed on host).
_SCALE_C = (1.0 / _IMAGENET_STD).astype(np.float32)             # (3,)
_BIAS_C = (-_IMAGENET_MEAN / _IMAGENET_STD).astype(np.float32)  # (3,)

# Per-input-block VMEM budget.  With double-buffered input + output blocks this
# is ~8 MiB live, comfortably under v5e's 16 MiB / v6e-v7x's 32 MiB scoped VMEM.
_BLOCK_BYTES = 2 * 1024 * 1024


def _norm_kernel(scale_ref, bias_ref, x_ref, o_ref):
    # x_ref / o_ref: (row_blk, tile_hw) blocks; scale/bias: (row_blk, 1).
    x = x_ref[...].astype(jnp.float32)
    y = x * scale_ref[...] + bias_ref[...]      # lane-broadcast of per-row affine
    o_ref[...] = y.astype(o_ref.dtype)


def _row_block(rows: int, itemsize: int) -> int:
    """Rows per block: full sublane occupancy (multiple of the sublane packing
    for this dtype) and a multiple of 3 so the RGB pattern is identical in
    every row block.  Falls back to the full row extent (always legal)."""
    sub = max(8, 32 // max(1, itemsize))        # 8 (f32) / 16 (bf16) / 32 (int8)
    unit = 3 * sub                              # lcm(3, sub)
    return rows if rows < unit else unit


def _spatial_tile(hw: int, row_blk: int, itemsize: int) -> int:
    """Lane-dense spatial tile (multiple of 128) within the VMEM budget, or the
    full extent when it already fits.  Partial last blocks are masked by
    Pallas, so no divisor search and no dependence on H*W's factorization."""
    max_lanes = _BLOCK_BYTES // (row_blk * itemsize)
    max_lanes = max(128, (max_lanes // 128) * 128)
    return hw if hw <= max_lanes else max_lanes


def imagenet_input_norm(x: jax.Array, out_dtype=None) -> jax.Array:
    """(x - mean) / std per channel; x is NCHW with C == 3.

    `out_dtype` lets callers fuse a downcast (e.g. bf16) into the store."""
    n, c, h, w = x.shape
    assert c == 3, "ImageNetInputNorm expects 3 input channels (RGB)"
    out_dtype = x.dtype if out_dtype is None else out_dtype

    rows = n * c
    hw = h * w
    itemsize = x.dtype.itemsize
    x2d = x.reshape(rows, hw)                   # free: contiguous NCHW reshape

    row_blk = _row_block(rows, itemsize)
    tile_hw = _spatial_tile(hw, row_blk, itemsize)

    # v7x has two TensorCores per chip: make sure the parallel grid has >= 2
    # steps whenever the spatial axis can still be split lane-densely.
    if pl.cdiv(rows, row_blk) == 1 and tile_hw == hw and hw >= 256:
        tile_hw = max(128, ((hw // 2) // 128) * 128)

    grid = (pl.cdiv(rows, row_blk), pl.cdiv(hw, tile_hw))

    # Per-row folded affine.  The RGB pattern repeats every 3 rows and every
    # row block starts at a multiple of row_blk (itself a multiple of 3), so a
    # single (row_blk, 1) tile serves every grid step; its block index is
    # constant so Pallas fetches it only once.
    reps = row_blk // 3
    scale = jnp.asarray(np.tile(_SCALE_C, reps).reshape(row_blk, 1))
    bias = jnp.asarray(np.tile(_BIAS_C, reps).reshape(row_blk, 1))

    out2d = pl.pallas_call(
        _norm_kernel,
        out_shape=jax.ShapeDtypeStruct((rows, hw), out_dtype),
        grid=grid,
        in_specs=[
            pl.BlockSpec((row_blk, 1), lambda i, j: (0, 0)),        # scale
            pl.BlockSpec((row_blk, 1), lambda i, j: (0, 0)),        # bias
            pl.BlockSpec((row_blk, tile_hw), lambda i, j: (i, j)),  # x
        ],
        out_specs=pl.BlockSpec((row_blk, tile_hw), lambda i, j: (i, j)),
        compiler_params=pltpu.CompilerParams(
            dimension_semantics=("parallel", "parallel")
        ),
    )(scale, bias, x2d)

    return out2d.reshape(n, c, h, w)


if __name__ == "__main__":
    key = jax.random.PRNGKey(0)
    # NCHW input; the module hard-codes 3 channels (RGB).
    x = jax.random.uniform(key, (2, 3, 16, 16), dtype=jnp.float32)

    out = jax.block_until_ready(imagenet_input_norm(x))

    # Reference in plain JAX (same math the PyTorch module does).
    mean = jnp.asarray(_IMAGENET_MEAN).reshape(1, 3, 1, 1)
    std = jnp.asarray(_IMAGENET_STD).reshape(1, 3, 1, 1)
    ref = (x - mean) / std

    assert out.shape == x.shape
    assert out.dtype == x.dtype
    assert jnp.allclose(out, ref, atol=1e-5, rtol=1e-5)

    print("KERNEL_OK")
</pallas_src>

<mosaic_0001>
module attributes {stable_mosaic.version = 11 : i64} {
  func.func @_norm_kernel(%arg0: i32, %arg1: i32, %arg2: memref<6x1xf32, #tpu.memory_space<vmem>>, %arg3: memref<6x1xf32, #tpu.memory_space<vmem>>, %arg4: memref<6x128xf32, #tpu.memory_space<vmem>>, %arg5: memref<6x128xf32, #tpu.memory_space<vmem>>) attributes {dimension_semantics = [#tpu.dimension_semantics<parallel>, #tpu.dimension_semantics<parallel>], iteration_bounds = array<i64: 1, 2>, scalar_prefetch = 0 : i64, scratch_operands = 0 : i64, tpu.core_type = #tpu.core_type<tc>, window_params = [{pipeline_mode = #tpu.pipeline_mode<synchronous>, transform_indices = @transform_0, window_bounds = array<i64: 6, 1>}, {pipeline_mode = #tpu.pipeline_mode<synchronous>, transform_indices = @transform_1, window_bounds = array<i64: 6, 1>}, {transform_indices = @transform_2, window_bounds = array<i64: 6, 128>}, {transform_indices = @transform_3, window_bounds = array<i64: 6, 128>}]} {
    %c0 = arith.constant 0 : index
    %c0_0 = arith.constant 0 : index
    %0 = vector.load %arg4[%c0, %c0_0] : memref<6x128xf32, #tpu.memory_space<vmem>>, vector<6x128xf32>
    %c0_1 = arith.constant 0 : index
    %c0_2 = arith.constant 0 : index
    %1 = vector.load %arg2[%c0_1, %c0_2] : memref<6x1xf32, #tpu.memory_space<vmem>>, vector<6x1xf32>
    %2 = vector.broadcast %1 : vector<6x1xf32> to vector<6x128xf32>
    %3 = arith.mulf %0, %2 : vector<6x128xf32>
    %c0_3 = arith.constant 0 : index
    %c0_4 = arith.constant 0 : index
    %4 = vector.load %arg3[%c0_3, %c0_4] : memref<6x1xf32, #tpu.memory_space<vmem>>, vector<6x1xf32>
    %5 = vector.broadcast %4 : vector<6x1xf32> to vector<6x128xf32>
    %6 = arith.addf %3, %5 : vector<6x128xf32>
    %c0_5 = arith.constant 0 : index
    %c0_6 = arith.constant 0 : index
    %7 = vector.load %arg5[%c0_5, %c0_6] : memref<6x128xf32, #tpu.memory_space<vmem>>, vector<6x128xf32>
    tpu.vector_store %arg5[%c0_5, %c0_6], %6 {strides = array<i32>} : memref<6x128xf32, #tpu.memory_space<vmem>>, vector<6x128xf32>,
    return
  }
  func.func @transform_0(%arg0: i32, %arg1: i32) -> (i32, i32) {
    %c0_i32 = arith.constant 0 : i32
    %c0_i32_0 = arith.constant 0 : i32
    %c0_i32_1 = arith.constant 0 : i32
    return %c0_i32, %c0_i32_0 : i32, i32
  }
  func.func @transform_1(%arg0: i32, %arg1: i32) -> (i32, i32) {
    %c0_i32 = arith.constant 0 : i32
    %c0_i32_0 = arith.constant 0 : i32
    %c0_i32_1 = arith.constant 0 : i32
    return %c0_i32, %c0_i32_0 : i32, i32
  }
  func.func @transform_2(%arg0: i32, %arg1: i32) -> (i32, i32) {
    %c0_i32 = arith.constant 0 : i32
    return %arg0, %arg1 : i32, i32
  }
  func.func @transform_3(%arg0: i32, %arg1: i32) -> (i32, i32) {
    %c0_i32 = arith.constant 0 : i32
    return %arg0, %arg1 : i32, i32
  }
}

</mosaic_0001>

<bundles_post_ra>
// kernel: tpu_custom_call.1
= control target key start
LH: loop header
LB: loop body
LE: loop exit
PB: predicated region body
PF: predicated region fallthrough
CT: control target
= control target key end

     0   :  { %8 = vsyncpa [#allocation3], 0  ;;  %s589_s0 = inlined_call_operand.vmem [shape: f32[6,1], index: 0, kind: input, shape index: {}]   ;;  %s590_s1 = inlined_call_operand.vmem [shape: f32[6,1], index: 1, kind: input, shape index: {}]   ;;  %s591_s2 = inlined_call_operand.vmem [shape: f32[6,256], index: 2, kind: input, shape index: {}]   ;;  %s592_s3 = inlined_call_operand.hbm [shape: f32[6,256], index: 3, kind: output, shape index: {}]  }
   0x1   :  { %10 = vsyncpa [#allocation3 + $0x1], 0  ;;  %s471_s12 = smov 0   ;;  %s473_s13 = smov 0  }
   0x2   :  { %s475_s14 = smov 0   ;;  %s477_s15 = smov 0  }
   0x3   :  { %s479_s16 = smov 0   ;;  %s481_s17 = smov 0  }
   0x4 LB: > { %s301_s18 = sadd.s32 4294967295, %s447_s17   ;;  %s302_s19 = sadd.s32 4294967294, %s447_s17   ;;  %s447_s17 = sphi %s481_s17, %s16_s17   ;;  %s443_s16 = sphi %s479_s16, %s599_s16   ;;  %s439_s15 = sphi %s477_s15, %s598_s15   ;;  %s435_s14 = sphi %s475_s14, %s597_s14   ;;  %s431_s13 = sphi %s473_s13, %s596_s13   ;;  %s427_s12 = sphi %s471_s12, %s595_s12  }
   0x5   : > { %s25_s20 = sadd.s32 1, %s443_s16  ;;  %s107_s21 = sadd.s32 1, %s435_s14 }
   0x6   : > { %p26_p0 = scmp.ge.s32.totalorder %s25_s20, 2  ;;  %p117_p1 = scmp.ne.s32.totalorder %s435_s14, %s431_s13 }
   0x7   : > { %p118_p2 = scmp.eq.s32.totalorder %s301_s18, 1  ;;  %p123_p3 = scmp.ne.s32.totalorder %s431_s13, %s427_s12 }
   0x8   : > { %s601_s20 = smov (%p26_p0, %s25_s20), 0  ;;  %p124_p5 = scmp.eq.s32.totalorder %s302_s19, 1 }
   0x9   : > { %p511_p4 = por %p118_p2, %p117_p1  ;;  %s103_s23 = ssub.s32 %s443_s16, %s601_s20 }
   0xa   : > { %p305_p6 = scmp.ge.s32.totalorder %s447_s17, 1  ;;  %p105_p7 = scmp.eq.s32.totalorder %s103_s23, 0 }
   0xb   : > { %p518_p8 = por %p124_p5, %p123_p3  ;;  %p159_p9 = scmp.lt.s32.totalorder %s447_s17, 3 }
   0xc   : > { %s524_s25 = scalar_select %p105_p7, %s435_s14, %s107_s21  }
   0xd   : > { %p160_p10 = pnand %p305_p6, %p159_p9 }
   0xe   : > { %v195_v0 = vld [vmem:[%s589_s0] sm:$0x3f] (!%p160_p10)  ;;  %v449_v1 = vmov (!%p160_p10), 0   ;;  %p188_p11 = scmp.lt.s32.totalorder (!%p160_p10), %s439_s15, 1  ;;  %s183_s4 = sand.u32 (!%p160_p10), 1, %s431_s13  }
   0xf   : > { %163 = sbr.rel (%p160_p10) target bundleno = 164 (0xa4), region = 32  ;;  %368 = vset.pattern.permute.xlu0 (!%p160_p10), %v449_v1  ;;  %v202_v2 = vld [vmem:[%s590_s1] sm:$0x3f] (!%p160_p10)  ;;  %s306_s6 = sshll.u32 (!%p160_p10), %s183_s4, 3 }
  0x10   : > { %198 = vperm.xlu0 (!%p160_p10), %368, %v195_v0   ;;  %s309_s10 = sshll.u32 (!%p160_p10), %s439_s15, 7  ;;  %s185_s11 = scalar_lea.vmem (!%p160_p10), [#allocation2], %s306_s6 }
  0x11   : > { %s226_s18 = sshll.u32 (!%p160_p10), %s185_s11, 4  ;;  %s542_s23 = scalar_lea.hbm (!%p160_p10), %s592_s3, %s309_s10  ;;  %s544_s18 = int_to_ptr.vmem [resolvable:$true] %s226_s18 }
  0x12   : > { %s211_s26 = scalar_lea.sflag (!%p160_p10), [#allocation3], %s183_s4  ;;  %s369_s27 = scalar_lea.vmem (!%p160_p10), %s544_s18, 128 }
  0x13   : > { %p370_p12 = scmp.ne.s32.totalorder (!%p160_p10), %s544_s18, %s369_s27 }
  0x14   : > { %205 = vperm.xlu0 (!%p160_p10), %368, %v202_v2  }
  0x15   : > { %p371_p13 = pnand (!%p160_p10), %p370_p12, %p511_p4 }
  0x16   : > { %s189_s30 = scalar_select %p188_p11, %s439_s15, 1 }
  0x17   : > { %p372_p0 = pneg %p371_p13  ;;  %s450_s15 = smov [#allocation2]  }
  0x18   : > { %s307_s5 = sshll.u32 %s189_s30, 3  ;;  %s373_s28 = sshll.u32 %s450_s15, 4  ;;  %s374_s28 = int_to_ptr.vmem [resolvable:$false] %s373_s28 }
  0x19   : > { %s193_s9 = scalar_lea.vmem %s591_s2, %s307_s5  ;;  %s375_s29 = scalar_lea.vmem %s374_s28, 256 }
  0x1a   : > { %v194_v4 = vld [vmem:[%s193_s9] sm:$0x3f]  ;;  %p376_p1 = scmp.lt.s32.totalorder %s544_s18, %s374_s28  ;;  %p377_p2 = scmp.lt.s32.totalorder %s375_s29, %s369_s27 }
  0x1c   : > { %p378_p3 = por %p377_p2, %p376_p1 }
  0x1e   : > { %p379_p5 = pnand %p378_p3, %p372_p0 }
  0x8f   : > { %v199_v3 = vpop.permute.xlu0 %198 }
  0x90   : > { %v201_v5 = vmul.f32 %v199_v3, %v194_v4 }
  0x93   : > { %v206_v6 = vpop.permute.xlu0 %205 }
  0x94   : > { %v208_v7 = vadd.f32 %v206_v6, %v201_v5 }
  0x96   : > { %209 = vst [vmem:[%s185_s11] sm:$0x3f] %v208_v7 }
  0x97   : > { %382 = shalt.err (!%p379_p5)
}
  0x98   : > { %s383_s30 = scalar_lea.hbm %s542_s23, 128  ;;  %s387_s6 = scalar_lea.hbm %s592_s3, 256 }
  0x99   : > { %p384_p6 = scmp.ne.s32.totalorder %s542_s23, %s383_s30  ;;  %p388_p10 = scmp.lt.u32.totalorder %s542_s23, %s592_s3 }
  0x9a   : > { %p389_p11 = scmp.lt.u32.totalorder %s387_s6, %s383_s30  ;;  %p391_p13 = scmp.lt.u32.totalorder %s383_s30, %s542_s23 }
  0x9b   : > { %p385_p7 = pnand %p384_p6, %p511_p4 }
  0x9c   : > { %p390_p12 = por %p389_p11, %p388_p10 }
  0x9d   : > { %p386_p9 = pneg %p385_p7 }
  0x9e   : > { %p392_p0 = por %p391_p13, %p390_p12 }
  0xa0   : > { %p393_p1 = pnand %p392_p0, %p386_p9 }
  0xa2   : > { %396 = shalt.err (!%p393_p1)
}
  0xa3   : > { %312 = dma.vmem_to_hbm [thread:$0]  (%p511_p4), %s544_s18, 128, %s542_s23, %s211_s26  }
  0xa4 PF: > { %p318_p2 = scmp.ge.s32.totalorder %s447_s17, 2  ;;  %s238_s9 = sand.u32 1, %s427_s12  }
  0xa5   : > { %s239_s10 = scalar_lea.sflag [#allocation3], %s238_s9 }
  0xa6   : > { %p315_p3 = pnand %p318_p2, %p518_p8 }
  0xa8   : > { %422 = dma.done.wait (!%p315_p3), %s239_s10, 128  }
  0xa9   : > { %424 = vsyncadd (!%p315_p3), %s239_s10, 4294967168  ;;  %s16_s17 = sadd.s32 1, %s447_s17   ;;  %s595_s12 = smov %s431_s13 }
  0xaa   : > { %p13_p5 = scmp.ge.s32.totalorder %s16_s17, 4   ;;  %s596_s13 = smov %s435_s14 }
  0xab   : > { %s597_s14 = smov %s524_s25  ;;  %s598_s15 = smov %s443_s16 }
  0xac   : > { %s599_s16 = smov %s601_s20  ;;  %15 = sbr.rel (!%p13_p5) target bundleno = 4 (0x4), region = 67 }
  0xb3   :  { %244 = vsyncpa [#allocation3], 1 }
  0xb4   :  { %246 = vsyncpa [#allocation3 + $0x1], 1 }

</bundles_post_ra>
